<compile_context>
chip_gen: v5e
topology: v5e:2x2
jax: 0.10.0
libtpu: 0.0.40
codegen_flags: <defaults>
</compile_context>

<pallas_src>
import jax
import jax.numpy as jnp
import numpy as np
from jax.experimental import pallas as pl
from jax.experimental.pallas import tpu as pltpu

# ----------------------------- model config ---------------------------------
VOCAB_SIZE = 50
EMBED_SIZE = 32
NUM_CLASSES = 4
KERNEL_SIZES = (3, 4, 5)
NUM_FILTERS = 16
BATCH = 2
SEQ_LEN = 16

K_MAX = max(KERNEL_SIZES)
PAD = K_MAX - 1                                   # per-sequence zero-pad rows
LP = SEQ_LEN + PAD                                # padded sequence length
NF_TOTAL = len(KERNEL_SIZES) * NUM_FILTERS        # 3F = 48
N_OUT = BATCH * LP - PAD                          # conv accumulator rows (36)


def cnn_text_kernel(emb_ref, wpack_ref, bpack_ref, mask_ref, wfc_ref, bfc_ref,
                    out_ref, pool_ref):
    """Single grid step processes the entire batch.

    emb_ref  : [B*(L+PAD), E]  per-sequence zero-padded embeddings, flattened
    wpack_ref: [K_MAX, E, 3F]  conv weights packed over kernel sizes
                               (zero slices for shifts j >= k)
    bpack_ref: [1, 3F]         packed conv biases
    mask_ref : [N_OUT, 3F]     1.0 where the conv position is a valid output
                               for that filter's kernel size, else 0.0
    wfc_ref  : [3F, C]         fc weight
    bfc_ref  : [1, C]          fc bias
    out_ref  : [B, C]          logits
    pool_ref : VMEM [B, 3F]    scratch for pooled features
    """
    emb = emb_ref[...]                                        # [B*(L+PAD), E]

    # Conv1d (all kernel sizes at once) as K_MAX shifted matmuls on the MXU.
    acc = jnp.zeros((N_OUT, NF_TOTAL), jnp.float32)
    for j in range(K_MAX):                                    # static unroll (5)
        acc += jnp.dot(emb[j:j + N_OUT, :], wpack_ref[j],
                       preferred_element_type=jnp.float32)
    acc = jnp.maximum(acc + bpack_ref[...], 0.0)              # bias + ReLU
    acc = acc * mask_ref[...]      # zero invalid positions (>= l_out / padding)

    # Max over time per sequence.  After ReLU all valid values are >= 0, so the
    # zeroed invalid rows never win the max.
    for b in range(BATCH):                                    # static, tiny B
        pool_ref[b:b + 1, :] = jnp.max(
            acc[b * LP:b * LP + SEQ_LEN, :], axis=0, keepdims=True)

    # Dropout: identity in eval mode.  Single fused FC for the whole batch.
    out_ref[...] = (jnp.dot(pool_ref[...], wfc_ref[...],
                            preferred_element_type=jnp.float32)
                    + bfc_ref[...]).astype(out_ref.dtype)


def _pack_conv_params(params):
    """Pack per-kernel-size conv weights/biases into single tensors."""
    wpack = jnp.zeros((K_MAX, EMBED_SIZE, NF_TOTAL), jnp.float32)
    biases = []
    for i, k in enumerate(KERNEL_SIZES):
        w = params[f"conv{k}_w"]                              # [k, E, F]
        wpack = wpack.at[:k, :, i * NUM_FILTERS:(i + 1) * NUM_FILTERS].set(w)
        biases.append(params[f"conv{k}_b"])                   # [1, F]
    bpack = jnp.concatenate(biases, axis=1)                   # [1, 3F]
    return wpack, bpack


def _valid_position_mask():
    """mask[p, f] = 1.0 iff position p (within its sequence) is a valid conv
    output for the kernel size owning feature column f."""
    pos = jnp.arange(N_OUT, dtype=jnp.int32) % LP                     # [N_OUT]
    k_per_col = jnp.repeat(jnp.asarray(KERNEL_SIZES, jnp.int32), NUM_FILTERS)
    limit = SEQ_LEN - k_per_col                                       # [3F]
    return (pos[:, None] <= limit[None, :]).astype(jnp.float32)       # [N_OUT,3F]


def _full_spec(arr):
    nd = arr.ndim
    return pl.BlockSpec(arr.shape, lambda i: (0,) * nd)


def cnn_text_forward(x_ids, params):
    """x_ids: int32 [B, L] token indices.  Returns logits [B, C]."""
    # NOTE: the torch model raises ValueError on out-of-range ids.  That check
    # is host-blocking / un-jittable, so it lives in validate_token_ids()
    # instead of here.  jnp.take clamps OOB indices on TPU.
    emb = jnp.take(params["embedding"], x_ids, axis=0)        # [B, L, E]
    emb = jnp.pad(emb, ((0, 0), (0, PAD), (0, 0)))            # [B, L+PAD, E]
    emb_flat = emb.reshape(BATCH * LP, EMBED_SIZE)            # [B*(L+PAD), E]

    wpack, bpack = _pack_conv_params(params)
    mask = _valid_position_mask()
    wfc, bfc = params["fc_w"], params["fc_b"]

    return pl.pallas_call(
        cnn_text_kernel,
        out_shape=jax.ShapeDtypeStruct((BATCH, NUM_CLASSES), jnp.float32),
        grid_spec=pltpu.PrefetchScalarGridSpec(
            num_scalar_prefetch=0,
            grid=(1,),                               # whole batch in one step
            in_specs=[_full_spec(emb_flat), _full_spec(wpack),
                      _full_spec(bpack), _full_spec(mask),
                      _full_spec(wfc), _full_spec(bfc)],
            out_specs=pl.BlockSpec((BATCH, NUM_CLASSES), lambda i: (0, 0)),
            scratch_shapes=[pltpu.VMEM((BATCH, NF_TOTAL), jnp.float32)]),
        compiler_params=pltpu.CompilerParams(
            dimension_semantics=("arbitrary",)),
    )(emb_flat, wpack, bpack, mask, wfc, bfc)


def validate_token_ids(x_ids, vocab_size):
    """Host-side replica of the torch ValueError check, kept OUT of the hot
    path (it forces a device->host sync)."""
    ids = np.asarray(jax.device_get(x_ids))
    if (ids >= vocab_size).any() or (ids < 0).any():
        raise ValueError(
            f"Out-of-range token index found: {ids.max()} "
            f"(vocab size is {vocab_size})")


def init_params(key):
    ks = jax.random.split(key, 9)
    scale = 0.1
    params = {
        "embedding": scale * jax.random.normal(ks[0], (VOCAB_SIZE, EMBED_SIZE),
                                               jnp.float32),
        "fc_w": scale * jax.random.normal(
            ks[1], (len(KERNEL_SIZES) * NUM_FILTERS, NUM_CLASSES), jnp.float32),
        "fc_b": scale * jax.random.normal(ks[2], (1, NUM_CLASSES), jnp.float32),
    }
    for i, k in enumerate(KERNEL_SIZES):
        params[f"conv{k}_w"] = scale * jax.random.normal(
            ks[3 + 2 * i], (k, EMBED_SIZE, NUM_FILTERS), jnp.float32)
        params[f"conv{k}_b"] = scale * jax.random.normal(
            ks[4 + 2 * i], (1, NUM_FILTERS), jnp.float32)
    return params


def reference_forward(x_ids, params):
    """Pure-JAX reference mirroring the torch forward (eval mode)."""
    emb = jnp.take(params["embedding"], x_ids, axis=0)        # [B, L, E]
    pools = []
    for k in KERNEL_SIZES:
        w, b = params[f"conv{k}_w"], params[f"conv{k}_b"]
        l_out = emb.shape[1] - k + 1
        acc = jnp.zeros((emb.shape[0], l_out, NUM_FILTERS), jnp.float32)
        for j in range(k):
            acc += jnp.einsum("ble,ef->blf", emb[:, j:j + l_out, :], w[j])
        acc = jnp.maximum(acc + b[None, :, :], 0.0)
        pools.append(jnp.max(acc, axis=1))                    # [B, F]
    feat = jnp.concatenate(pools, axis=1)                     # [B, 3F]
    return feat @ params["fc_w"] + params["fc_b"]             # [B, C]


if __name__ == "__main__":
    key = jax.random.PRNGKey(0)
    pkey, xkey = jax.random.split(key)
    params = init_params(pkey)
    x = jax.random.randint(xkey, (BATCH, SEQ_LEN), 0, VOCAB_SIZE,
                           dtype=jnp.int32)

    validate_token_ids(x, VOCAB_SIZE)     # mirrors torch ValueError, off hot path

    fwd = jax.jit(cnn_text_forward)
    out = jax.block_until_ready(fwd(x, params))

    ref = reference_forward(x, params)
    assert out.shape == (BATCH, NUM_CLASSES)
    assert jnp.allclose(out, ref, atol=1e-4, rtol=1e-4), (out, ref)

    print("KERNEL_OK")
</pallas_src>

<mosaic_0001>
module attributes {stable_mosaic.version = 11 : i64} {
  func.func @cnn_text_kernel(%arg0: i32, %arg1: memref<40x32xf32, #tpu.memory_space<vmem>>, %arg2: memref<5x32x48xf32, #tpu.memory_space<vmem>>, %arg3: memref<1x48xf32, #tpu.memory_space<vmem>>, %arg4: memref<36x48xf32, #tpu.memory_space<vmem>>, %arg5: memref<48x4xf32, #tpu.memory_space<vmem>>, %arg6: memref<1x4xf32, #tpu.memory_space<vmem>>, %arg7: memref<2x4xf32, #tpu.memory_space<vmem>>, %arg8: memref<2x48xf32, #tpu.memory_space<vmem>>) attributes {dimension_semantics = [#tpu.dimension_semantics<arbitrary>], iteration_bounds = array<i64: 1>, scalar_prefetch = 0 : i64, scratch_operands = 1 : i64, tpu.core_type = #tpu.core_type<tc>, window_params = [{pipeline_mode = #tpu.pipeline_mode<synchronous>, transform_indices = @transform_0, window_bounds = array<i64: 40, 32>}, {pipeline_mode = #tpu.pipeline_mode<synchronous>, transform_indices = @transform_1, window_bounds = array<i64: 5, 32, 48>}, {pipeline_mode = #tpu.pipeline_mode<synchronous>, transform_indices = @transform_2, window_bounds = array<i64: 1, 48>}, {pipeline_mode = #tpu.pipeline_mode<synchronous>, transform_indices = @transform_3, window_bounds = array<i64: 36, 48>}, {pipeline_mode = #tpu.pipeline_mode<synchronous>, transform_indices = @transform_4, window_bounds = array<i64: 48, 4>}, {pipeline_mode = #tpu.pipeline_mode<synchronous>, transform_indices = @transform_5, window_bounds = array<i64: 1, 4>}, {pipeline_mode = #tpu.pipeline_mode<synchronous>, transform_indices = @transform_6, window_bounds = array<i64: 2, 4>}]} {
    %c0 = arith.constant 0 : index
    %c0_0 = arith.constant 0 : index
    %0 = vector.load %arg1[%c0, %c0_0] : memref<40x32xf32, #tpu.memory_space<vmem>>, vector<40x32xf32>
    %cst = arith.constant 0.000000e+00 : f32
    %1 = vector.broadcast %cst : f32 to vector<36x48xf32>
    %2 = vector.extract_strided_slice %0 {offsets = [0, 0], sizes = [36, 32], strides = [1, 1]} : vector<40x32xf32> to vector<36x32xf32>
    %c0_1 = arith.constant 0 : index
    %c0_2 = arith.constant 0 : index
    %c0_3 = arith.constant 0 : index
    %3 = vector.load %arg2[%c0_1, %c0_2, %c0_3] : memref<5x32x48xf32, #tpu.memory_space<vmem>>, vector<1x32x48xf32>
    %4 = vector.shape_cast %3 : vector<1x32x48xf32> to vector<32x48xf32>
    %cst_4 = arith.constant dense<0.000000e+00> : vector<36x48xf32>
    %5 = tpu.matmul %2, %4, %cst_4 {dimension_numbers = #tpu.dot_dimension_numbers<[1], [0], [0], [1], [0, 0, 1, 1], [], []>} : vector<36x32xf32>, vector<32x48xf32>, vector<36x48xf32> -> vector<36x48xf32>
    %6 = arith.addf %1, %5 : vector<36x48xf32>
    %7 = vector.extract_strided_slice %0 {offsets = [1, 0], sizes = [36, 32], strides = [1, 1]} : vector<40x32xf32> to vector<36x32xf32>
    %c1 = arith.constant 1 : index
    %c0_5 = arith.constant 0 : index
    %c0_6 = arith.constant 0 : index
    %8 = vector.load %arg2[%c1, %c0_5, %c0_6] : memref<5x32x48xf32, #tpu.memory_space<vmem>>, vector<1x32x48xf32>
    %9 = vector.shape_cast %8 : vector<1x32x48xf32> to vector<32x48xf32>
    %cst_7 = arith.constant dense<0.000000e+00> : vector<36x48xf32>
    %10 = tpu.matmul %7, %9, %cst_7 {dimension_numbers = #tpu.dot_dimension_numbers<[1], [0], [0], [1], [0, 0, 1, 1], [], []>} : vector<36x32xf32>, vector<32x48xf32>, vector<36x48xf32> -> vector<36x48xf32>
    %11 = arith.addf %6, %10 : vector<36x48xf32>
    %12 = vector.extract_strided_slice %0 {offsets = [2, 0], sizes = [36, 32], strides = [1, 1]} : vector<40x32xf32> to vector<36x32xf32>
    %c2 = arith.constant 2 : index
    %c0_8 = arith.constant 0 : index
    %c0_9 = arith.constant 0 : index
    %13 = vector.load %arg2[%c2, %c0_8, %c0_9] : memref<5x32x48xf32, #tpu.memory_space<vmem>>, vector<1x32x48xf32>
    %14 = vector.shape_cast %13 : vector<1x32x48xf32> to vector<32x48xf32>
    %cst_10 = arith.constant dense<0.000000e+00> : vector<36x48xf32>
    %15 = tpu.matmul %12, %14, %cst_10 {dimension_numbers = #tpu.dot_dimension_numbers<[1], [0], [0], [1], [0, 0, 1, 1], [], []>} : vector<36x32xf32>, vector<32x48xf32>, vector<36x48xf32> -> vector<36x48xf32>
    %16 = arith.addf %11, %15 : vector<36x48xf32>
    %17 = vector.extract_strided_slice %0 {offsets = [3, 0], sizes = [36, 32], strides = [1, 1]} : vector<40x32xf32> to vector<36x32xf32>
    %c3 = arith.constant 3 : index
    %c0_11 = arith.constant 0 : index
    %c0_12 = arith.constant 0 : index
    %18 = vector.load %arg2[%c3, %c0_11, %c0_12] : memref<5x32x48xf32, #tpu.memory_space<vmem>>, vector<1x32x48xf32>
    %19 = vector.shape_cast %18 : vector<1x32x48xf32> to vector<32x48xf32>
    %cst_13 = arith.constant dense<0.000000e+00> : vector<36x48xf32>
    %20 = tpu.matmul %17, %19, %cst_13 {dimension_numbers = #tpu.dot_dimension_numbers<[1], [0], [0], [1], [0, 0, 1, 1], [], []>} : vector<36x32xf32>, vector<32x48xf32>, vector<36x48xf32> -> vector<36x48xf32>
    %21 = arith.addf %16, %20 : vector<36x48xf32>
    %22 = vector.extract_strided_slice %0 {offsets = [4, 0], sizes = [36, 32], strides = [1, 1]} : vector<40x32xf32> to vector<36x32xf32>
    %c4 = arith.constant 4 : index
    %c0_14 = arith.constant 0 : index
    %c0_15 = arith.constant 0 : index
    %23 = vector.load %arg2[%c4, %c0_14, %c0_15] : memref<5x32x48xf32, #tpu.memory_space<vmem>>, vector<1x32x48xf32>
    %24 = vector.shape_cast %23 : vector<1x32x48xf32> to vector<32x48xf32>
    %cst_16 = arith.constant dense<0.000000e+00> : vector<36x48xf32>
    %25 = tpu.matmul %22, %24, %cst_16 {dimension_numbers = #tpu.dot_dimension_numbers<[1], [0], [0], [1], [0, 0, 1, 1], [], []>} : vector<36x32xf32>, vector<32x48xf32>, vector<36x48xf32> -> vector<36x48xf32>
    %26 = arith.addf %21, %25 : vector<36x48xf32>
    %c0_17 = arith.constant 0 : index
    %c0_18 = arith.constant 0 : index
    %27 = vector.load %arg3[%c0_17, %c0_18] : memref<1x48xf32, #tpu.memory_space<vmem>>, vector<1x48xf32>
    %28 = vector.broadcast %27 : vector<1x48xf32> to vector<36x48xf32>
    %29 = arith.addf %26, %28 : vector<36x48xf32>
    %cst_19 = arith.constant 0.000000e+00 : f32
    %30 = vector.broadcast %cst_19 : f32 to vector<36x48xf32>
    %31 = arith.maximumf %29, %30 : vector<36x48xf32>
    %c0_20 = arith.constant 0 : index
    %c0_21 = arith.constant 0 : index
    %32 = vector.load %arg4[%c0_20, %c0_21] : memref<36x48xf32, #tpu.memory_space<vmem>>, vector<36x48xf32>
    %33 = arith.mulf %31, %32 : vector<36x48xf32>
    %34 = vector.extract_strided_slice %33 {offsets = [0, 0], sizes = [16, 48], strides = [1, 1]} : vector<36x48xf32> to vector<16x48xf32>
    %cst_22 = arith.constant dense<0xFF800000> : vector<48xf32>
    %35 = vector.multi_reduction <maximumf>, %34, %cst_22 [0] : vector<16x48xf32> to vector<48xf32>
    %36 = vector.shape_cast %35 : vector<48xf32> to vector<1x48xf32>
    %c0_23 = arith.constant 0 : index
    %c0_24 = arith.constant 0 : index
    %37 = vector.load %arg8[%c0_23, %c0_24] : memref<2x48xf32, #tpu.memory_space<vmem>>, vector<1x48xf32>
    tpu.vector_store %arg8[%c0_23, %c0_24], %36 {strides = array<i32>} : memref<2x48xf32, #tpu.memory_space<vmem>>, vector<1x48xf32>,
    %38 = vector.extract_strided_slice %33 {offsets = [20, 0], sizes = [16, 48], strides = [1, 1]} : vector<36x48xf32> to vector<16x48xf32>
    %cst_25 = arith.constant dense<0xFF800000> : vector<48xf32>
    %39 = vector.multi_reduction <maximumf>, %38, %cst_25 [0] : vector<16x48xf32> to vector<48xf32>
    %40 = vector.shape_cast %39 : vector<48xf32> to vector<1x48xf32>
    %c1_26 = arith.constant 1 : index
    %c0_27 = arith.constant 0 : index
    %41 = vector.load %arg8[%c1_26, %c0_27] : memref<2x48xf32, #tpu.memory_space<vmem>>, vector<1x48xf32>
    tpu.vector_store %arg8[%c1_26, %c0_27], %40 {strides = array<i32>} : memref<2x48xf32, #tpu.memory_space<vmem>>, vector<1x48xf32>,
    %c0_28 = arith.constant 0 : index
    %c0_29 = arith.constant 0 : index
    %42 = vector.load %arg8[%c0_28, %c0_29] : memref<2x48xf32, #tpu.memory_space<vmem>>, vector<2x48xf32>
    %c0_30 = arith.constant 0 : index
    %c0_31 = arith.constant 0 : index
    %43 = vector.load %arg5[%c0_30, %c0_31] : memref<48x4xf32, #tpu.memory_space<vmem>>, vector<48x4xf32>
    %cst_32 = arith.constant dense<0.000000e+00> : vector<2x4xf32>
    %44 = tpu.matmul %42, %43, %cst_32 {dimension_numbers = #tpu.dot_dimension_numbers<[1], [0], [0], [1], [0, 0, 1, 1], [], []>} : vector<2x48xf32>, vector<48x4xf32>, vector<2x4xf32> -> vector<2x4xf32>
    %c0_33 = arith.constant 0 : index
    %c0_34 = arith.constant 0 : index
    %45 = vector.load %arg6[%c0_33, %c0_34] : memref<1x4xf32, #tpu.memory_space<vmem>>, vector<1x4xf32>
    %46 = vector.broadcast %45 : vector<1x4xf32> to vector<2x4xf32>
    %47 = arith.addf %44, %46 : vector<2x4xf32>
    %c0_35 = arith.constant 0 : index
    %c0_36 = arith.constant 0 : index
    %48 = vector.load %arg7[%c0_35, %c0_36] : memref<2x4xf32, #tpu.memory_space<vmem>>, vector<2x4xf32>
    tpu.vector_store %arg7[%c0_35, %c0_36], %47 {strides = array<i32>} : memref<2x4xf32, #tpu.memory_space<vmem>>, vector<2x4xf32>,
    return
  }
  func.func @transform_0(%arg0: i32) -> (i32, i32) {
    %c0_i32 = arith.constant 0 : i32
    %c0_i32_0 = arith.constant 0 : i32
    %c0_i32_1 = arith.constant 0 : i32
    return %c0_i32, %c0_i32_0 : i32, i32
  }
  func.func @transform_1(%arg0: i32) -> (i32, i32, i32) {
    %c0_i32 = arith.constant 0 : i32
    %c0_i32_0 = arith.constant 0 : i32
    %c0_i32_1 = arith.constant 0 : i32
    %c0_i32_2 = arith.constant 0 : i32
    return %c0_i32, %c0_i32_0, %c0_i32_1 : i32, i32, i32
  }
  func.func @transform_2(%arg0: i32) -> (i32, i32) {
    %c0_i32 = arith.constant 0 : i32
    %c0_i32_0 = arith.constant 0 : i32
    %c0_i32_1 = arith.constant 0 : i32
    return %c0_i32, %c0_i32_0 : i32, i32
  }
  func.func @transform_3(%arg0: i32) -> (i32, i32) {
    %c0_i32 = arith.constant 0 : i32
    %c0_i32_0 = arith.constant 0 : i32
    %c0_i32_1 = arith.constant 0 : i32
    return %c0_i32, %c0_i32_0 : i32, i32
  }
  func.func @transform_4(%arg0: i32) -> (i32, i32) {
    %c0_i32 = arith.constant 0 : i32
    %c0_i32_0 = arith.constant 0 : i32
    %c0_i32_1 = arith.constant 0 : i32
    return %c0_i32, %c0_i32_0 : i32, i32
  }
  func.func @transform_5(%arg0: i32) -> (i32, i32) {
    %c0_i32 = arith.constant 0 : i32
    %c0_i32_0 = arith.constant 0 : i32
    %c0_i32_1 = arith.constant 0 : i32
    return %c0_i32, %c0_i32_0 : i32, i32
  }
  func.func @transform_6(%arg0: i32) -> (i32, i32) {
    %c0_i32 = arith.constant 0 : i32
    %c0_i32_0 = arith.constant 0 : i32
    %c0_i32_1 = arith.constant 0 : i32
    return %c0_i32, %c0_i32_0 : i32, i32
  }
}

</mosaic_0001>

<bundles_post_ra>
// kernel: cnn_text_forward.1
= control target key start
LH: loop header
LB: loop body
LE: loop exit
PB: predicated region body
PF: predicated region fallthrough
CT: control target
= control target key end

     0   :  { %vm43_vm0 = vcmask 1046528   ;;  %vm53_vm1 = vcmask 261120   ;;  %s750_s0 = inlined_call_operand.vmem [shape: f32[40,32], index: 0, kind: input, shape index: {}]   ;;  %s751_s1 = inlined_call_operand.vmem [shape: f32[5,32,48], index: 1, kind: input, shape index: {}]   ;;  %s752_s2 = inlined_call_operand.vmem [shape: f32[1,48], index: 2, kind: input, shape index: {}]   ;;  %s753_s3 = inlined_call_operand.vmem [shape: f32[36,48], index: 3, kind: input, shape index: {}]   ;;  %s754_s4 = inlined_call_operand.vmem [shape: f32[48,4], index: 4, kind: input, shape index: {}]   ;;  %s755_s5 = inlined_call_operand.vmem [shape: f32[1,4], index: 5, kind: input, shape index: {}]   ;;  %s756_s6 = inlined_call_operand.hbm [shape: f32[2,4], index: 6, kind: output, shape index: {}]  }
   0x1   :  { %v429_v0 = vld [vmem:[%s751_s1 + $0x38] sm:$0xff]  ;;  %v428_v2 = vld [vmem:[%s751_s1 + $0x30] sm:$0xff]  ;;  %v427_v4 = vld [vmem:[%s751_s1 + $0x28] sm:$0xff] }
   0x2   :  { %v32_v1 = vld [vmem:[%s751_s1 + $0x18] sm:$0xff]  ;;  %468 = vmatpush.msra.mxu2 %v429_v0  ;;  %469 = vmatpush.msra.mxu3 %v429_v0  ;;  %v31_v3 = vld [vmem:[%s751_s1 + $0x10] sm:$0xff]  ;;  %v30_v6 = vld [vmem:[%s751_s1 + $0x8] sm:$0xff] }
   0x3   :  { %118 = vmatpush.msra.mxu1 %v32_v1  ;;  %v559_v5 = vld [vmem:[%s750_s0 + $0x10] sm:$0xff]  ;;  %76 = vmatpush.msra.mxu0 %v429_v0  ;;  %v567_v7 = vld [vmem:[%s750_s0 + $0x18] sm:$0xff]  ;;  %v573_v9 = vld [vmem:[%s750_s0 + $0x20] sm:$0xff] }
   0x4   :  { %470 = vmatpush.msra.mxu2 %v428_v2  ;;  %471 = vmatpush.msra.mxu3 %v428_v2  ;;  %v47_v8 = vrot.slane %v559_v5, 1  ;;  %v426_v10 = vld [vmem:[%s751_s1 + $0x20] sm:$0xff]  ;;  %v49_v11 = vrot.slane %v567_v7, 1  ;;  %v51_v12 = vrot.slane %v573_v9, 1  ;;  %v593_v17 = vld [vmem:[%s750_s0 + $0x8] sm:$0xff]  ;;  %v452_v19 = vld [vmem:[%s751_s1 + $0x78] sm:$0xff] }
   0x5   :  { %119 = vmatpush.msra.mxu1 %v31_v3  ;;  %77 = vmatpush.msra.mxu0 %v428_v2  ;;  %v29_v13 = vld [vmem:[%s751_s1] sm:$0xff]  ;;  %v443_v20 = vld [vmem:[%s751_s1 + $0x58] sm:$0xff]  ;;  %v45_v21 = vrot.slane %v593_v17, 1  ;;  %v442_v22 = vld [vmem:[%s751_s1 + $0x50] sm:$0xff] }
   0x6   :  { %472 = vmatpush.msra.mxu2 %v427_v4  ;;  %473 = vmatpush.msra.mxu3 %v427_v4  ;;  %v586_v14 = vld [vmem:[%s750_s0] sm:$0xff]  ;;  %v50_v15 = vsel %vm43_vm0, %v47_v8, %v49_v11  ;;  %v52_v16 = vsel %vm43_vm0, %v49_v11, %v51_v12  ;;  %v451_v23 = vld [vmem:[%s751_s1 + $0x70] sm:$0xff] }
   0x7   :  { %120 = vmatpush.msra.mxu1 %v30_v6  ;;  %78 = vmatpush.msra.mxu0 %v427_v4  ;;  %v44_v18 = vrot.slane %v586_v14, 1 }
   0x8   :  { %474 = vmatpush.msra.mxu2 %v426_v10  ;;  %475 = vmatpush.msra.mxu3 %v426_v10 }
   0x9   :  { %121 = vmatpush.msra.mxu1 %v29_v13  ;;  %432 = vmatmul.msk.f32.vlgmr.msra.gmra.mxu2 %vm53_vm1, %v50_v15 }
   0xa   :  { %433 = vmatmul.msk.f32.vlgmr.msra.gmra.mxu3 %vm53_vm1, %v52_v16  ;;  %435 = vmatmul.msk.f32.vlgmr.msra.gmra.mxu1 %vm53_vm1, %v586_v14 }
   0xb   :  { %11 = vsyncpa [#allocation4], 0  ;;  %237 = vmatpush.msrb.mxu3 %v452_v19  ;;  %175 = vmatpush.msrb.mxu2 %v443_v20  ;;  %v46_v24 = vsel %vm43_vm0, %v44_v18, %v45_v21  ;;  %v441_v25 = vld [vmem:[%s751_s1 + $0x48] sm:$0xff]  ;;  %v144_v26 = vrot.slane %v586_v14, 2  ;;  %v145_v27 = vrot.slane %v593_v17, 2  ;;  %vm143_vm2 = vcmask 1045504  }
   0xc   :  { %79 = vmatpush.msra.mxu0 %v426_v10  ;;  %v450_v28 = vld [vmem:[%s751_s1 + $0x68] sm:$0xff]  ;;  %v461_v29 = vld [vmem:[%s751_s1 + $0x98] sm:$0xff]  ;;  %v440_v30 = vld [vmem:[%s751_s1 + $0x40] sm:$0xff]  ;;  %v48_v35 = vsel %vm43_vm0, %v45_v21, %v47_v8  ;;  %v206_v36 = vrot.slane %v586_v14, 3  ;;  %v207_v37 = vrot.slane %v593_v17, 3  ;;  %v147_v38 = vrot.slane %v559_v5, 2 }
   0xd   :  { %176 = vmatpush.msrb.mxu2 %v442_v22  ;;  %238 = vmatpush.msrb.mxu3 %v451_v23  ;;  %v449_v31 = vld [vmem:[%s751_s1 + $0x60] sm:$0xff]  ;;  %v146_v32 = vsel %vm143_vm2, %v144_v26, %v145_v27  ;;  %v460_v33 = vld [vmem:[%s751_s1 + $0x90] sm:$0xff]  ;;  %v459_v34 = vld [vmem:[%s751_s1 + $0x88] sm:$0xff]  ;;  %vm205_vm3 = vcmask 1044480   ;;  %v268_v41 = vrot.slane %v586_v14, 4  ;;  %v269_v42 = vrot.slane %v593_v17, 4 }
   0xe   :  { %430 = vmatmul.msk.f32.vlgmr.msra.gmra.mxu0 %vm53_vm1, %v46_v24  ;;  %v458_v39 = vld [vmem:[%s751_s1 + $0x80] sm:$0xff]  ;;  %v208_v40 = vsel %vm205_vm3, %v206_v36, %v207_v37  ;;  %v148_v43 = vsel %vm143_vm2, %v145_v27, %v147_v38  ;;  %vm267_vm4 = vcmask 1043456   ;;  %v209_v44 = vrot.slane %v559_v5, 3  ;;  %v380_v11 = vld [vmem:[%s754_s4 + $0x28] sm:$0xff]  ;;  %v377_v26 = vld [vmem:[%s754_s4 + $0x10] sm:$0xff]  ;;  %s505_s19 = smov [#allocation3]  }
   0xf   :  { %177 = vmatpush.msrb.mxu2 %v441_v25  ;;  %239 = vmatpush.msrb.mxu3 %v450_v28  ;;  %v270_v45 = vsel %vm267_vm4, %v268_v41, %v269_v42  ;;  %v149_v46 = vrot.slane %v567_v7, 2  ;;  %v271_v48 = vrot.slane %v559_v5, 4  ;;  %v211_v50 = vrot.slane %v567_v7, 3  ;;  %v703_v14 = vld [vmem:[%s752_s2] ss:$0 sm:$0xff]  ;;  %v378_v25 = vld [vmem:[%s754_s4 + $0x18] sm:$0xff] }
  0x10   :  { %299 = vmatpush.msrb.mxu0 %v461_v29  ;;  %v210_v47 = vsel %vm205_vm3, %v207_v37, %v209_v44  ;;  %v151_v52 = vrot.slane %v573_v9, 2  ;;  %v273_v54 = vrot.slane %v567_v7, 4  ;;  %v213_v56 = vrot.slane %v573_v9, 3  ;;  %398 = vmatpush.msrb.mxu1 %v380_v11  ;;  %v338_v27 = vld [vmem:[%s753_s3] sm:$0xff]  ;;  %v376_v29 = vld [vmem:[%s754_s4 + $0x8] sm:$0xff]  ;;  %s415_s20 = sshll.u32 %s505_s19, 4  ;;  %s416_s20 = int_to_ptr.vmem [resolvable:$true] %s415_s20 }
  0x11   :  { %178 = vmatpush.msrb.mxu2 %v440_v30  ;;  %240 = vmatpush.msrb.mxu3 %v449_v31  ;;  %v150_v49 = vsel %vm143_vm2, %v147_v38, %v149_v46  ;;  %v272_v51 = vsel %vm267_vm4, %v269_v42, %v271_v48  ;;  %v212_v53 = vsel %vm205_vm3, %v209_v44, %v211_v50  ;;  %v275_v59 = vrot.slane %v573_v9, 4  ;;  %v339_v30 = vld [vmem:[%s753_s3 + $0x8] sm:$0xff]  ;;  %v342_v11 = vld [vmem:[%s753_s3 + $0x20] sm:$0xf]  ;;  %s417_s22 = sshll.u32 %s756_s6, 4  ;;  %s418_s22 = int_to_ptr.hbm [resolvable:$true] %s417_s22 }
  0x12   :  { %434 = vmatmul.msk.f32.gmra.mxu3 %vm53_vm1, %v51_v12  ;;  %436 = vmatmul.msk.f32.gmra.mxu1 %vm53_vm1, %v593_v17  ;;  %v152_v55 = vsel %vm143_vm2, %v149_v46, %v151_v52  ;;  %v274_v57 = vsel %vm267_vm4, %v271_v48, %v273_v54  ;;  %v214_v58 = vsel %vm205_vm3, %v211_v50, %v213_v56  ;;  %v379_v12 = vld [vmem:[%s754_s4 + $0x20] sm:$0xff]  ;;  %vm348_vm5 = vcmask 392192  }
  0x13   :  { %444 = vmatmul.msk.f32.vlgmr.msrb.gmra.mxu2 %vm53_vm1, %v146_v32  ;;  %300 = vmatpush.msrb.mxu0 %v460_v33  ;;  %v276_v60 = vsel %vm267_vm4, %v273_v54, %v275_v59  ;;  %vm358_vm6 = vcmask 385024   ;;  %vm360_vm7 = vcmask 392196   ;;  %vm363_vm8 = vcmask 388096  }
  0x14   :  { %399 = vmatpush.msrb.mxu1 %v379_v12  ;;  %vm408_vm9 = vcmask 25600  }
  0x15   :  { %301 = vmatpush.msrb.mxu0 %v459_v34  ;;  %v375_v34 = vld [vmem:[%s754_s4] sm:$0xff] }
  0x16   :  { %431 = vmatmul.msk.f32.gmra.mxu0 %vm53_vm1, %v48_v35  ;;  %400 = vmatpush.msrb.mxu1 %v378_v25 }
  0x17   :  { %302 = vmatpush.msrb.mxu0 %v458_v39 }
  0x18   :  { %401 = vmatpush.msrb.mxu1 %v377_v26  ;;  %v478_v26 = vld [vmem:[%s755_s5] ss:$0 sm:$0xff] }
  0x1a   :  { %437 = vmatmul.msk.f32.gmra.mxu1 %vm53_vm1, %v559_v5  ;;  %453 = vmatmul.msk.f32.vlgmr.msrb.gmra.mxu3 %vm53_vm1, %v208_v40 }
  0x1b   :  { %445 = vmatmul.msk.f32.gmra.mxu2 %vm53_vm1, %v148_v43  ;;  %402 = vmatpush.msrb.mxu1 %v376_v29 }
  0x1d   :  { %403 = vmatpush.msrb.mxu1 %v375_v34 }
  0x1e   :  { %462 = vmatmul.msk.f32.vlgmr.msrb.gmra.mxu0 %vm53_vm1, %v270_v45 }
  0x22   :  { %438 = vmatmul.msk.f32.gmra.mxu1 %vm53_vm1, %v567_v7  ;;  %454 = vmatmul.msk.f32.gmra.mxu3 %vm53_vm1, %v210_v47 }
  0x23   :  { %446 = vmatmul.msk.f32.gmra.mxu2 %vm53_vm1, %v150_v49 }
  0x26   :  { %463 = vmatmul.msk.f32.gmra.mxu0 %vm53_vm1, %v272_v51 }
  0x2a   :  { %439 = vmatmul.msk.f32.gmra.mxu1 %vm53_vm1, %v573_v9  ;;  %455 = vmatmul.msk.f32.gmra.mxu3 %vm53_vm1, %v212_v53 }
  0x2b   :  { %447 = vmatmul.msk.f32.gmra.mxu2 %vm53_vm1, %v152_v55 }
  0x2e   :  { %464 = vmatmul.msk.f32.gmra.mxu0 %vm53_vm1, %v274_v57 }
  0x32   :  { %456 = vmatmul.msk.f32.gmra.mxu3 %vm53_vm1, %v214_v58 }
  0x33   :  { %448 = vmatmul.msk.f32.gmra.mxu2 %vm53_vm1, %v151_v52 }
  0x36   :  { %465 = vmatmul.msk.f32.gmra.mxu0 %vm53_vm1, %v276_v60 }
  0x3a   :  { %457 = vmatmul.msk.f32.gmra.mxu3 %vm53_vm1, %v213_v56 }
  0x3e   :  { %466 = vmatmul.msk.f32.gmra.mxu0 %vm53_vm1, %v275_v59 }
  0x87   :  { %v123_v0 = vpop.f32.mrf.mxu1 }
  0x8b   :  { %v81_v61 = vpop.f32.mrf.mxu0 }
  0x8c   :  { %v87_v62 = vpop.f32.mrf.mxu2  ;;  %v124_v5 = vadd.f32 %v123_v0, %v81_v61  ;;  %v341_v0 = vld [vmem:[%s753_s3 + $0x18] sm:$0xff] }
  0x8d   :  { %v90_v63 = vpop.f32.mrf.mxu3 }
  0x8f   :  { %v126_v4 = vpop.f32.mrf.mxu1 }
  0x93   :  { %v84_v1 = vpop.f32.mrf.mxu0 }
  0x94   :  { %v127_v15 = vadd.f32 %v126_v4, %v84_v1 }
  0x95   :  { %v692_v2 = vpop.f32.mrf.mxu3 }
  0x96   :  { %v180_v3 = vpop.f32.mrf.mxu2 }
  0x97   :  { %v195_v7 = vadd.f32 %v180_v3, %v124_v5  ;;  %v129_v16 = vpop.f32.mrf.mxu1 }
  0x98   :  { %v130_v37 = vadd.f32 %v129_v16, %v87_v62 }
  0x9b   :  { %v304_v6 = vpop.f32.mrf.mxu0 }
  0x9d   :  { %v242_v8 = vpop.f32.mrf.mxu3 }
  0x9e   :  { %v183_v9 = vpop.f32.mrf.mxu2  ;;  %v257_v10 = vadd.f32 %v242_v8, %v195_v7 }
  0x9f   :  { %v196_v18 = vadd.f32 %v183_v9, %v127_v15  ;;  %v132_v35 = vpop.f32.mrf.mxu1 }
  0xa0   :  { %v319_v13 = vadd.f32 %v304_v6, %v257_v10  ;;  %v133_v44 = vadd.f32 %v132_v35, %v90_v63 }
  0xa2   :  { %v328_v19 = vadd.f32 %v703_v14, %v319_v13 }
  0xa3   :  { %v307_v17 = vpop.f32.mrf.mxu0 }
  0xa4   :  { %v333_v23 = vmax.f32 %v328_v19, 0.0 }
  0xa5   :  { %v245_v20 = vpop.f32.mrf.mxu3 }
  0xa6   :  { %v186_v21 = vpop.f32.mrf.mxu2  ;;  %v258_v22 = vadd.f32 %v245_v20, %v196_v18  ;;  %v343_v32 = vmul.f32 %v338_v27, %v333_v23 }
  0xa7   :  { %v197_v40 = vadd.f32 %v186_v21, %v130_v37  ;;  %v135_v53 = vpop.f32.mrf.mxu1 }
  0xa8   :  { %v320_v24 = vadd.f32 %v307_v17, %v258_v22  ;;  %v349_v41 = vsel %vm348_vm5, %v343_v32, -inf  ;;  %v136_v58 = vadd.f32 %v135_v53, %v692_v2  ;;  %v340_v2 = vld [vmem:[%s753_s3 + $0x10] sm:$0xff] }
  0xaa   :  { %v329_v28 = vadd.f32 %v703_v14, %v320_v24 }
  0xab   :  { %v310_v31 = vpop.f32.mrf.mxu0 }
  0xac   :  { %v334_v33 = vmax.f32 %v329_v28, 0.0 }
  0xad   :  { %v248_v36 = vpop.f32.mrf.mxu3 }
  0xae   :  { %v344_v38 = vmul.f32 %v339_v30, %v334_v33  ;;  %v189_v39 = vpop.f32.mrf.mxu2  ;;  %v259_v45 = vadd.f32 %v248_v36, %v197_v40 }
  0xaf   :  { %v198_v48 = vadd.f32 %v189_v39, %v133_v44 }
  0xb0   :  { %v350_v42 = vsel %vm348_vm5, %v344_v38, -inf  ;;  %v321_v51 = vadd.f32 %v310_v31, %v259_v45 }
  0xb1   :  { %v351_v43 = vmax.f32 %v349_v41, %v350_v42 }
  0xb2   :  { %v330_v59 = vadd.f32 %v703_v14, %v321_v51 }
  0xb3   :  { %v313_v46 = vpop.f32.mrf.mxu0  ;;  %v352_v47 = vrot.slane %v351_v43, 4 }
  0xb4   :  { %v335_v5 = vmax.f32 %v330_v59, 0.0 }
  0xb5   :  { %v251_v49 = vpop.f32.mrf.mxu3  ;;  %v353_v50 = vmax.f32 %v351_v43, %v352_v47 }
  0xb6   :  { %v260_v52 = vadd.f32 %v251_v49, %v198_v48  ;;  %v192_v56 = vpop.f32.mrf.mxu2  ;;  %v345_v9 = vmul.f32 %v340_v2, %v335_v5 }
  0xb7   :  { %v354_v54 = vrot.slane %v353_v50, 2  ;;  %v199_v62 = vadd.f32 %v192_v56, %v136_v58 }
  0xb8   :  { %v322_v55 = vadd.f32 %v313_v46, %v260_v52  ;;  %v361_v15 = vsel %vm360_vm7, %v345_v9, -inf }
  0xb9   :  { %v355_v57 = vmax.f32 %v353_v50, %v354_v54 }
  0xba   :  { %v331_v60 = vadd.f32 %v703_v14, %v322_v55 }
  0xbb   :  { %v356_v61 = vrot.slane %v355_v57, 1  ;;  %v316_v3 = vpop.f32.mrf.mxu0 }
  0xbc   :  { %v336_v63 = vmax.f32 %v331_v60, 0.0 }
  0xbd   :  { %v254_v1 = vpop.f32.mrf.mxu3  ;;  %v357_v4 = vmax.f32 %v355_v57, %v356_v61 }
  0xbe   :  { %v261_v6 = vadd.f32 %v254_v1, %v199_v62  ;;  %v346_v7 = vmul.f32 %v341_v0, %v336_v63 }
  0xbf   :  { %359 = vst.msk [vmem:[#allocation2] sm:$0x1] %vm358_vm6, %v357_v4 }
  0xc0   :  { %v323_v8 = vadd.f32 %v316_v3, %v261_v6  ;;  %v362_v13 = vsel %vm348_vm5, %v346_v7, -inf }
  0xc1   :  { %v365_v17 = vmax.f32 %v361_v15, %v362_v13 }
  0xc2   :  { %v332_v10 = vadd.f32 %v703_v14, %v323_v8 }
  0xc4   :  { %v337_v12 = vmax.f32 %v332_v10, 0.0 }
  0xc6   :  { %v347_v16 = vmul.f32 %v342_v11, %v337_v12 }
  0xc8   :  { %v364_v18 = vsel %vm363_vm8, %v347_v16, -inf }
  0xc9   :  { %v366_v19 = vmax.f32 %v365_v17, %v364_v18 }
  0xcb   :  { %v367_v20 = vrot.slane %v366_v19, 4 }
  0xcd   :  { %v368_v21 = vmax.f32 %v366_v19, %v367_v20 }
  0xcf   :  { %v369_v22 = vrot.slane %v368_v21, 2 }
  0xd1   :  { %v370_v23 = vmax.f32 %v368_v21, %v369_v22 }
  0xd3   :  { %v371_v24 = vrot.slane %v370_v23, 1 }
  0xd5   :  { %v372_v14 = vmax.f32 %v370_v23, %v371_v24 }
  0xd7   :  { %373 = vst.msk [vmem:[#allocation2 + $0x1] sm:$0x1] %vm358_vm6, %v372_v14 }
  0xde   :  { %v374_v25 = vld [vmem:[#allocation2] sm:$0x3] }
  0xdf   :  { %467 = vmatmul.msk.f32.vlgmr.msrb.gmra.mxu1 %vm348_vm5, %v374_v25 }
 0x15c   :  { %v405_v27 = vpop.f32.mrf.mxu1 }
 0x15d   :  { %v406_v28 = vadd.f32 %v478_v26, %v405_v27 }
 0x15f   :  { %409 = vst.msk [vmem:[#allocation3] sm:$0x3] %vm408_vm9, %v406_v28 }
 0x160   :  { %420 = dma.vmem_to_hbm [thread:$0]  %s416_s20, 32, %s418_s22, [#allocation4]  }
 0x161   :  { %503 = dma.done.wait [#allocation4], 32  }
 0x162   :  { %504 = vsyncadd [#allocation4], 4294967264 }
 0x163   :  { %425 = vsyncpa [#allocation4], 1 }

</bundles_post_ra>
